<compile_context>
chip_gen: v6e
topology: v6e:2x2x1
jax: 0.10.0
libtpu: 0.0.40
codegen_flags: <defaults>
</compile_context>

<pallas_src>
import functools

import jax
import jax.numpy as jnp
from jax import lax
from jax.experimental import pallas as pl
from jax.experimental.pallas import tpu as pltpu

_LANES = 128
_SUBLANES = 8
_CHUNK_ROWS = 64           # rows folded per loop iteration (8 f32 vregs/operand)
_TARGET_BLOCK_ROWS = 2048  # 2048x128 f32 = 1 MiB per input block per buffer


def _round_up(x, m):
    return ((x + m - 1) // m) * m


def _dice_partials_kernel(x_ref, t_ref, out_ref, *, block_rows, chunk_rows,
                          rows_valid, last_block_start, mask_last):
    """One grid step: emit (3, 8, 128) partial sums for this block."""
    nchunks = block_rows // chunk_rows
    unroll = True if nchunks <= 8 else 2

    def run(masked):
        def body(g, carry):
            acc_i, acc_s, acc_t = carry
            r0 = pl.multiple_of(g * chunk_rows, chunk_rows)
            x = x_ref[pl.ds(r0, chunk_rows), :].astype(jnp.float32)
            t = t_ref[pl.ds(r0, chunk_rows), :].astype(jnp.float32)
            s = jax.nn.sigmoid(x)
            if masked:
                # Only the last (ragged) grid step pays for this.  Raggedness
                # is at row granularity (the <128-element tail is handled in
                # the wrapper), so a single sublane compare suffices.
                row = lax.broadcasted_iota(jnp.int32, (chunk_rows, _LANES), 0)
                valid = (last_block_start + r0 + row) < rows_valid
                s = jnp.where(valid, s, 0.0)
                t = jnp.where(valid, t, 0.0)

            def fold(v):
                # (chunk_rows, 128) -> (8, 128); reduction over the leading
                # axis is pure vreg-wise VPU adds (no XLU / cross-lane work).
                return v.reshape(chunk_rows // _SUBLANES, _SUBLANES,
                                 _LANES).sum(axis=0)

            return (acc_i + fold(s * t), acc_s + fold(s), acc_t + fold(t))

        zero = jnp.zeros((_SUBLANES, _LANES), jnp.float32)
        acc_i, acc_s, acc_t = lax.fori_loop(0, nchunks, body,
                                            (zero, zero, zero), unroll=unroll)
        out_ref[0] = acc_i  # partial intersection
        out_ref[1] = acc_s  # partial sum(sigmoid(inputs))
        out_ref[2] = acc_t  # partial sum(targets)

    if mask_last:
        last = pl.num_programs(0) - 1

        @pl.when(pl.program_id(0) == last)
        def _():
            run(masked=True)

        @pl.when(pl.program_id(0) != last)
        def _():
            run(masked=False)
    else:
        run(masked=False)


def _narrow_stream(a, is_target):
    """Keep narrow float dtypes (upcast in-kernel); bool targets -> bf16."""
    dt = a.dtype
    if jnp.issubdtype(dt, jnp.floating):
        return a if dt.itemsize in (2, 4) else a.astype(jnp.float32)
    if is_target and dt == jnp.bool_:
        return a.astype(jnp.bfloat16)  # exact for {0,1}; halves the HBM stream
    return a.astype(jnp.float32)


def dice_loss(inputs, targets, smooth=1.0):
    """Pallas TPU implementation of DiceLoss.forward (returns a scalar f32)."""
    x = _narrow_stream(jnp.ravel(inputs), is_target=False)
    t = _narrow_stream(jnp.ravel(targets), is_target=True)
    n = x.shape[0]

    # Sublane multiple required by the narrowest streamed dtype (8 for f32,
    # 16 for bf16/f16).
    sub = max(_SUBLANES, 32 // x.dtype.itemsize, 32 // t.dtype.itemsize)

    rows = n // _LANES       # full 128-lane rows streamed by the kernel
    n_main = rows * _LANES   # remaining (<128) tail elements reduced in JAX

    inter = jnp.float32(0.0)
    s_sum = jnp.float32(0.0)
    t_sum = jnp.float32(0.0)

    if rows >= sub:
        # Block size: as big as reasonable for large inputs, but always >= 2
        # grid steps when possible so the "parallel" grid axis can shard
        # across both TensorCores on v7x (no-op on single-core v5e/v6e).
        if rows >= 2 * _TARGET_BLOCK_ROWS:
            block_rows = _TARGET_BLOCK_ROWS
        elif rows >= 2 * _CHUNK_ROWS:
            block_rows = _round_up(pl.cdiv(rows, 2), _CHUNK_ROWS)
        elif rows >= 2 * sub:
            block_rows = _round_up(pl.cdiv(rows, 2), sub)
        else:
            block_rows = sub
        chunk_rows = min(_CHUNK_ROWS, block_rows)
        nblocks = pl.cdiv(rows, block_rows)
        mask_last = (rows % block_rows) != 0

        # For aligned inputs this slice+reshape is a no-op (no HBM copy);
        # for ragged inputs only the aligned prefix is touched (no jnp.pad).
        x2 = x[:n_main].reshape(rows, _LANES)
        t2 = t[:n_main].reshape(rows, _LANES)

        kernel = functools.partial(
            _dice_partials_kernel,
            block_rows=block_rows,
            chunk_rows=chunk_rows,
            rows_valid=rows,
            last_block_start=(nblocks - 1) * block_rows,
            mask_last=mask_last,
        )

        partials = pl.pallas_call(
            kernel,
            out_shape=jax.ShapeDtypeStruct((nblocks, 3, _SUBLANES, _LANES),
                                           jnp.float32),
            grid_spec=pltpu.PrefetchScalarGridSpec(
                num_scalar_prefetch=0,
                grid=(nblocks,),
                in_specs=[
                    pl.BlockSpec((block_rows, _LANES), lambda b: (b, 0)),
                    pl.BlockSpec((block_rows, _LANES), lambda b: (b, 0)),
                ],
                out_specs=pl.BlockSpec((None, 3, _SUBLANES, _LANES),
                                       lambda b: (b, 0, 0, 0)),
            ),
            compiler_params=pltpu.CompilerParams(
                dimension_semantics=("parallel",),
            ),
        )(x2, t2)

        # Final tree reduction + smooth epilogue in plain JAX (tiny).
        sums = jnp.sum(partials, axis=(0, 2, 3), dtype=jnp.float32)
        inter, s_sum, t_sum = sums[0], sums[1], sums[2]
    else:
        n_main = 0  # too small for a kernel launch; do it all in the tail

    if n_main < n:
        xt = x[n_main:].astype(jnp.float32)
        tt = t[n_main:].astype(jnp.float32)
        st = jax.nn.sigmoid(xt)
        inter = inter + jnp.sum(st * tt)
        s_sum = s_sum + jnp.sum(st)
        t_sum = t_sum + jnp.sum(tt)

    dice = (2.0 * inter + smooth) / (s_sum + t_sum + smooth)
    return 1.0 - dice


def _dice_loss_ref(inputs, targets, smooth=1.0):
    s = jax.nn.sigmoid(inputs.astype(jnp.float32)).ravel()
    t = targets.astype(jnp.float32).ravel()
    inter = jnp.sum(s * t)
    dice = (2.0 * inter + smooth) / (jnp.sum(s) + jnp.sum(t) + smooth)
    return 1.0 - dice


if __name__ == "__main__":
    key = jax.random.PRNGKey(0)
    k1, k2, k3, k4, k5, k6 = jax.random.split(key, 6)

    # NCHW, like the PyTorch segmentation-logits / binary-mask use case.
    x = jax.random.normal(k1, (2, 4, 16, 16), dtype=jnp.float32)
    tgt = (jax.random.uniform(k2, (2, 4, 16, 16)) > 0.5).astype(jnp.float32)
    loss = jax.block_until_ready(dice_loss(x, tgt, smooth=1.0))
    ref = _dice_loss_ref(x, tgt, smooth=1.0)
    assert jnp.allclose(loss, ref, atol=1e-5, rtol=1e-5), (loss, ref)

    # Ragged shape (rows not a multiple of block_rows and a <128-element tail):
    # exercises the gated last-block mask and the JAX tail path.
    x_r = jax.random.normal(k3, (2, 3, 17, 19), dtype=jnp.float32)
    t_r = (jax.random.uniform(k4, (2, 3, 17, 19)) > 0.5).astype(jnp.float32)
    loss_r = jax.block_until_ready(dice_loss(x_r, t_r, smooth=1.0))
    ref_r = _dice_loss_ref(x_r, t_r, smooth=1.0)
    assert jnp.allclose(loss_r, ref_r, atol=1e-5, rtol=1e-5), (loss_r, ref_r)

    # Slightly larger aligned shape: exercises the multi-chunk fori_loop path
    # and bool->bf16 target streaming.
    x_m = jax.random.normal(k5, (2, 4, 64, 64), dtype=jnp.float32)
    t_m = jax.random.uniform(k6, (2, 4, 64, 64)) > 0.5
    loss_m = jax.block_until_ready(dice_loss(x_m, t_m, smooth=1.0))
    ref_m = _dice_loss_ref(x_m, t_m.astype(jnp.float32), smooth=1.0)
    assert jnp.allclose(loss_m, ref_m, atol=1e-5, rtol=1e-5), (loss_m, ref_m)

    print("KERNEL_OK")
</pallas_src>

<mosaic_0001>
module attributes {stable_mosaic.version = 11 : i64} {
  func.func @_dice_partials_kernel(%arg0: i32, %arg1: memref<8x128xf32, #tpu.memory_space<vmem>>, %arg2: memref<8x128xf32, #tpu.memory_space<vmem>>, %arg3: memref<1x3x8x128xf32, #tpu.memory_space<vmem>>) attributes {dimension_semantics = [#tpu.dimension_semantics<parallel>], iteration_bounds = array<i64: 2>, scalar_prefetch = 0 : i64, scratch_operands = 0 : i64, tpu.core_type = #tpu.core_type<tc>, window_params = [{transform_indices = @transform_0, window_bounds = array<i64: 8, 128>}, {transform_indices = @transform_1, window_bounds = array<i64: 8, 128>}, {transform_indices = @transform_2, window_bounds = array<i64: 1, 3, 8, 128>}]} {
    %cst = arith.constant 0.000000e+00 : f32
    %0 = vector.broadcast %cst : f32 to vector<8x128xf32>
    %c0_i32 = arith.constant 0 : i32
    %c8_i32 = arith.constant 8 : i32
    %1 = arith.muli %c0_i32, %c8_i32 : i32
    %2 = tpu.assume_multiple %1, 8 : i32
    %3 = arith.index_cast %2 : i32 to index
    %c0 = arith.constant 0 : index
    %4 = vector.load %arg1[%3, %c0] : memref<8x128xf32, #tpu.memory_space<vmem>>, vector<8x128xf32>
    %5 = arith.index_cast %2 : i32 to index
    %c0_0 = arith.constant 0 : index
    %6 = vector.load %arg2[%5, %c0_0] : memref<8x128xf32, #tpu.memory_space<vmem>>, vector<8x128xf32>
    %7 = arith.negf %4 : vector<8x128xf32>
    %8 = math.exp %7 : vector<8x128xf32>
    %cst_1 = arith.constant 1.000000e+00 : f32
    %9 = vector.broadcast %cst_1 : f32 to vector<8x128xf32>
    %10 = arith.addf %9, %8 : vector<8x128xf32>
    %11 = arith.divf %9, %10 : vector<8x128xf32>
    %12 = arith.mulf %11, %6 : vector<8x128xf32>
    %13 = vector.shape_cast %12 : vector<8x128xf32> to vector<1x8x128xf32>
    %cst_2 = arith.constant dense<0.000000e+00> : vector<8x128xf32>
    %14 = vector.multi_reduction <add>, %13, %cst_2 [0] : vector<1x8x128xf32> to vector<8x128xf32>
    %15 = arith.addf %0, %14 : vector<8x128xf32>
    %16 = vector.shape_cast %11 : vector<8x128xf32> to vector<1x8x128xf32>
    %cst_3 = arith.constant dense<0.000000e+00> : vector<8x128xf32>
    %17 = vector.multi_reduction <add>, %16, %cst_3 [0] : vector<1x8x128xf32> to vector<8x128xf32>
    %18 = arith.addf %0, %17 : vector<8x128xf32>
    %19 = vector.shape_cast %6 : vector<8x128xf32> to vector<1x8x128xf32>
    %cst_4 = arith.constant dense<0.000000e+00> : vector<8x128xf32>
    %20 = vector.multi_reduction <add>, %19, %cst_4 [0] : vector<1x8x128xf32> to vector<8x128xf32>
    %21 = arith.addf %0, %20 : vector<8x128xf32>
    %c1_i32 = arith.constant 1 : i32
    %c0_5 = arith.constant 0 : index
    %c0_6 = arith.constant 0 : index
    %c0_7 = arith.constant 0 : index
    %c0_8 = arith.constant 0 : index
    %22 = vector.load %arg3[%c0_5, %c0_6, %c0_7, %c0_8] : memref<1x3x8x128xf32, #tpu.memory_space<vmem>>, vector<1x1x8x128xf32>
    %23 = vector.shape_cast %22 : vector<1x1x8x128xf32> to vector<8x128xf32>
    %24 = vector.shape_cast %15 : vector<8x128xf32> to vector<1x1x8x128xf32>
    tpu.vector_store %arg3[%c0_5, %c0_6, %c0_7, %c0_8], %24 {strides = array<i32>} : memref<1x3x8x128xf32, #tpu.memory_space<vmem>>, vector<1x1x8x128xf32>,
    %c0_9 = arith.constant 0 : index
    %c1 = arith.constant 1 : index
    %c0_10 = arith.constant 0 : index
    %c0_11 = arith.constant 0 : index
    %25 = vector.load %arg3[%c0_9, %c1, %c0_10, %c0_11] : memref<1x3x8x128xf32, #tpu.memory_space<vmem>>, vector<1x1x8x128xf32>
    %26 = vector.shape_cast %25 : vector<1x1x8x128xf32> to vector<8x128xf32>
    %27 = vector.shape_cast %18 : vector<8x128xf32> to vector<1x1x8x128xf32>
    tpu.vector_store %arg3[%c0_9, %c1, %c0_10, %c0_11], %27 {strides = array<i32>} : memref<1x3x8x128xf32, #tpu.memory_space<vmem>>, vector<1x1x8x128xf32>,
    %c0_12 = arith.constant 0 : index
    %c2 = arith.constant 2 : index
    %c0_13 = arith.constant 0 : index
    %c0_14 = arith.constant 0 : index
    %28 = vector.load %arg3[%c0_12, %c2, %c0_13, %c0_14] : memref<1x3x8x128xf32, #tpu.memory_space<vmem>>, vector<1x1x8x128xf32>
    %29 = vector.shape_cast %28 : vector<1x1x8x128xf32> to vector<8x128xf32>
    %30 = vector.shape_cast %21 : vector<8x128xf32> to vector<1x1x8x128xf32>
    tpu.vector_store %arg3[%c0_12, %c2, %c0_13, %c0_14], %30 {strides = array<i32>} : memref<1x3x8x128xf32, #tpu.memory_space<vmem>>, vector<1x1x8x128xf32>,
    return
  }
  func.func @transform_0(%arg0: i32) -> (i32, i32) {
    %c0_i32 = arith.constant 0 : i32
    %c0_i32_0 = arith.constant 0 : i32
    return %arg0, %c0_i32 : i32, i32
  }
  func.func @transform_1(%arg0: i32) -> (i32, i32) {
    %c0_i32 = arith.constant 0 : i32
    %c0_i32_0 = arith.constant 0 : i32
    return %arg0, %c0_i32 : i32, i32
  }
  func.func @transform_2(%arg0: i32) -> (i32, i32, i32, i32) {
    %c0_i32 = arith.constant 0 : i32
    %c0_i32_0 = arith.constant 0 : i32
    %c0_i32_1 = arith.constant 0 : i32
    %c0_i32_2 = arith.constant 0 : i32
    return %arg0, %c0_i32, %c0_i32_0, %c0_i32_1 : i32, i32, i32, i32
  }
}

</mosaic_0001>

<bundles_post_ra>
// kernel: tpu_custom_call.1
= control target key start
LH: loop header
LB: loop body
LE: loop exit
PB: predicated region body
PF: predicated region fallthrough
CT: control target
= control target key end

     0   :  { %7 = vsyncpa [#allocation3], 0  ;;  %s756_s0 = inlined_call_operand.hbm [shape: f32[16,128], index: 0, kind: input, shape index: {}]   ;;  %s757_s1 = inlined_call_operand.hbm [shape: f32[16,128], index: 1, kind: input, shape index: {}]   ;;  %s758_s2 = inlined_call_operand.hbm [shape: f32[2,3,8,128], index: 2, kind: output, shape index: {}]  }
   0x1   :  { %9 = vsyncpa [#allocation3 + $0x1], 0 }
   0x2   :  { %10 = vsyncpa [#allocation6], 0 }
   0x3   :  { %12 = vsyncpa [#allocation6 + $0x1], 0 }
   0x4   :  { %13 = vsyncpa [#allocation4], 0 }
   0x5   :  { %15 = vsyncpa [#allocation4 + $0x1], 0  ;;  %s547_s9 = smov 0   ;;  %s549_s10 = smov 0  }
   0x6   :  { %s551_s11 = smov 0   ;;  %s553_s12 = smov 0  }
   0x7 LB: > { %s568_s13 = sadd.s32 4294967295, %s525_s12   ;;  %s326_s14 = sadd.s32 4294967294, %s525_s12   ;;  %s525_s12 = sphi %s553_s12, %s777_s12   ;;  %s521_s11 = sphi %s551_s11, %s776_s11   ;;  %s517_s10 = sphi %s549_s10, %s775_s10   ;;  %s513_s9 = sphi %s547_s9, %s774_s9  }
   0x8   : > { %s572_s15 = sadd.s32 1, %s525_s12   ;;  %s28_s16 = sadd.s32 1, %s521_s11 }
   0x9   : > { %s25_s17 = ssub.s32 %s525_s12, %s572_s15  ;;  %p35_p0 = scmp.ne.s32.totalorder %s521_s11, %s517_s10 }
   0xa   : > { %p26_p1 = scmp.eq.s32.totalorder %s25_s17, 0  ;;  %p36_p2 = scmp.eq.s32.totalorder %s525_s12, 0 }
   0xb   : > { %p41_p3 = scmp.ne.s32.totalorder %s517_s10, %s513_s9  ;;  %p42_p4 = scmp.eq.s32.totalorder %s568_s13, 0 }
   0xc   : > { %s584_s18 = scalar_select %p26_p1, %s521_s11, %s28_s16  }
   0xd   : > { %p586_p5 = por %p36_p2, %p35_p0  ;;  %p590_p6 = por %p42_p4, %p41_p3 }
   0xe   : > { %p91_p7 = scmp.eq.s32.totalorder %s568_s13, 1  ;;  %p97_p8 = scmp.eq.s32.totalorder %s326_s14, 1 }
   0xf   : > { %s762_s20 = scalar_select %p590_p6, 1, 0 }
  0x10   : > { %p361_p10 = scmp.lt.s32.totalorder %s525_s12, 2  ;;  %p597_p11 = por %p91_p7, %p35_p0 }
  0x11   : > { %p601_p12 = por %p97_p8, %p41_p3  ;;  %s606_s23 = sand.u32 1, %s521_s11  }
  0x12   : > { %s763_s21 = scalar_select %p597_p11, 1, 0 }
  0x13   : > { %s764_s22 = scalar_select %p601_p12, 1, 0 }
  0x14   : > { %s330_s24 = sshll.u32 %s525_s12, 7  ;;  %s329_s25 = sshll.u32 %s606_s23, 3 }
  0x15   : > { %s615_s28 = scalar_lea.hbm %s756_s0, %s330_s24  ;;  %s121_s29 = scalar_lea.vmem [#allocation2], %s329_s25 }
  0x16   : > { %s128_s30 = sshll.u32 %s121_s29, 4  ;;  %p621_p13 = pnand %p361_p10, %p586_p5  ;;  %s625_s30 = int_to_ptr.vmem [resolvable:$true] %s128_s30 }
  0x17   : > { %s118_s4 = scalar_lea.sflag [#allocation3], %s606_s23  ;;  %s401_s5 = scalar_lea.hbm %s615_s28, 128 }
  0x18   : > { %p402_p2 = scmp.ne.s32.totalorder %s615_s28, %s401_s5  ;;  %p403_p3 = pneg %p621_p13 }
  0x19   : > { %s406_s8 = scalar_lea.hbm %s756_s0, 256  ;;  %p407_p5 = scmp.lt.s32.totalorder %s615_s28, %s756_s0 }
  0x1a   : > { %p404_p4 = pnand %p403_p3, %p402_p2  ;;  %p408_p8 = scmp.lt.s32.totalorder %s406_s8, %s401_s5 }
  0x1c   : > { %p405_p7 = pneg %p404_p4  ;;  %p409_p10 = por %p408_p8, %p407_p5 }
  0x1e   : > { %p410_p9 = pnand %p409_p10, %p405_p7 }
  0x20   : > { %413 = shalt.err (!%p410_p9)
}
  0x21   : > { %s414_s17 = scalar_lea.vmem %s625_s30, 128  ;;  %s527_s19 = smov [#allocation2]  }
  0x22   : > { %p415_p0 = scmp.ne.s32.totalorder %s625_s30, %s414_s17  ;;  %s419_s26 = sshll.u32 %s527_s19, 4  ;;  %s420_s26 = int_to_ptr.vmem [resolvable:$false] %s419_s26 }
  0x23   : > { %s421_s27 = scalar_lea.vmem %s420_s26, 256  ;;  %p422_p1 = scmp.lt.s32.totalorder %s625_s30, %s420_s26 }
  0x24   : > { %p417_p2 = pnand %p415_p0, %p403_p3  ;;  %p423_p12 = scmp.lt.s32.totalorder %s421_s27, %s414_s17 }
  0x26   : > { %p418_p4 = pneg %p417_p2  ;;  %p424_p11 = por %p423_p12, %p422_p1 }
  0x28   : > { %p425_p5 = pnand %p424_p11, %p418_p4 }
  0x2a   : > { %428 = shalt.err (!%p425_p5)
}
  0x2b   : > { %353 = dma.hbm_to_vmem [thread:$0]  (!%p621_p13), %s615_s28, 128, %s625_s30, %s118_s4  }
  0x2c   : > { %p766_p9 = scmp.lt.s32.totalorder %s525_s12, 3  ;;  %p767_p0 = scmp.ge.s32.totalorder %s525_s12, 1 }
  0x2d   : > { %s667_s7 = scalar_lea.hbm %s757_s1, %s330_s24  ;;  %s139_s8 = scalar_lea.vmem [#allocation5], %s329_s25 }
  0x2e   : > { %p658_p7 = pnand %p767_p0, %p766_p9  ;;  %s146_s14 = sshll.u32 %s139_s8, 4  ;;  %s147_s14 = int_to_ptr.vmem [resolvable:$true] %s146_s14 }
  0x2f   : > { %s136_s28 = scalar_lea.sflag [#allocation6], %s606_s23  ;;  %s429_s30 = scalar_lea.hbm %s667_s7, 128 }
  0x30   : > { %s768_s29 = scalar_select %p658_p7, 1, 0 }
  0x31   : > { %p430_p11 = scmp.ne.s32.totalorder %s667_s7, %s429_s30  ;;  %s434_s17 = scalar_lea.hbm %s757_s1, 256 }
  0x32   : > { %p435_p8 = scmp.lt.s32.totalorder %s667_s7, %s757_s1  ;;  %p436_p10 = scmp.lt.s32.totalorder %s434_s17, %s429_s30 }
  0x33   : > { %p432_p12 = pnand %p430_p11, %p403_p3 }
  0x34   : > { %p437_p2 = por %p436_p10, %p435_p8 }
  0x35   : > { %p433_p1 = pneg %p432_p12 }
  0x37   : > { %p438_p4 = pnand %p437_p2, %p433_p1 }
  0x39   : > { %441 = shalt.err (!%p438_p4)
}
  0x3a   : > { %s442_s25 = scalar_lea.vmem %s147_s14, 128  ;;  %s528_s23 = smov [#allocation5]  }
  0x3b   : > { %p443_p5 = scmp.ne.s32.totalorder %s147_s14, %s442_s25  ;;  %s447_s26 = sshll.u32 %s528_s23, 4  ;;  %s448_s26 = int_to_ptr.vmem [resolvable:$false] %s447_s26 }
  0x3c   : > { %s449_s27 = scalar_lea.vmem %s448_s26, 256  ;;  %p450_p11 = scmp.lt.s32.totalorder %s147_s14, %s448_s26 }
  0x3d   : > { %p445_p9 = pnand %p443_p5, %p403_p3  ;;  %p451_p12 = scmp.lt.s32.totalorder %s449_s27, %s442_s25 }
  0x3f   : > { %p446_p0 = pneg %p445_p9  ;;  %p452_p6 = por %p451_p12, %p450_p11 }
  0x41   : > { %p453_p7 = pnand %p452_p6, %p446_p0 }
  0x43   : > { %456 = shalt.err (!%p453_p7)
}
  0x44   : > { %356 = dma.hbm_to_vmem [thread:$0]  (!%p621_p13), %s667_s7, 128, %s147_s14, %s136_s28  }
  0x45   : > { %p769_p1 = scmp.ne.s32.totalorder %s768_s29, 0 }
  0x46   : > { %s693_s5 = sand.u32 (!%p769_p1), 1, %s517_s10   ;;  %p770_p3 = scmp.ne.s32.totalorder (!%p769_p1), %s762_s20, 0 }
  0x47   : > { %155 = sbr.rel (%p769_p1) target bundleno = 128 (0x80), region = 28  ;;  %s334_s6 = sshll.u32 (!%p769_p1), %s693_s5, 3 }
  0x48   : > { %s158_s8 = scalar_lea.sflag (!%p769_p1), [#allocation3], %s693_s5  ;;  %s161_s30 = scalar_lea.vmem (!%p769_p1), [#allocation2], %s334_s6 }
  0x4c   : > { %500 = dma.done.wait (%p770_p3), %s158_s8, 128  }
  0x4d   : > { %502 = vsyncadd (%p770_p3), %s158_s8, 4294967168  ;;  %s167_s3 = scalar_lea.sflag [#allocation6], %s693_s5  ;;  %s170_s7 = scalar_lea.vmem [#allocation5], %s334_s6 }
  0x4e   : > { %504 = dma.done.wait (%p770_p3), %s167_s3, 128  }
  0x4f   : > { %506 = vsyncadd (%p770_p3), %s167_s3, 4294967168  ;;  %s342_s29 = smul.u32 24, %s693_s5  ;;  %v196_v0 = vld [vmem:[%s161_s30] sm:$0xff]  ;;  %v197_v1 = vld [vmem:[%s170_s7] sm:$0xff]  ;;  %s217_s24 = scalar_lea.sflag [#allocation4], %s693_s5 }
  0x50   : > { %v336_v2 = vmul.f32 -1.442695, %v196_v0  ;;  %s343_s28 = smul.u32 384, %s568_s13  ;;  %p771_p13 = scmp.ne.s32.totalorder %s763_s21, 0 }
  0x51   : > { %s195_s14 = scalar_lea.vmem [#allocation7], %s342_s29  ;;  %s529_s13 = smov [#allocation7]  }
  0x52   : > { %338 = vst [vmem:[%s195_s14 + $0x10] sm:$0xff] %v197_v1  ;;  %397 = vpow2.f32 %v336_v2  ;;  %s230_s4 = sshll.u32 %s195_s14, 4  ;;  %s713_s17 = scalar_lea.hbm %s758_s2, %s343_s28  ;;  %s708_s4 = int_to_ptr.vmem [resolvable:$true] %s230_s4 }
  0x53   : > { %s457_s19 = scalar_lea.vmem %s708_s4, 384  ;;  %s461_s25 = sshll.u32 %s529_s13, 4  ;;  %s462_s25 = int_to_ptr.vmem [resolvable:$false] %s461_s25 }
  0x54   : > { %p458_p6 = scmp.ne.s32.totalorder %s708_s4, %s457_s19  ;;  %s463_s23 = scalar_lea.vmem %s462_s25, 768 }
  0x55   : > { %p464_p10 = scmp.lt.s32.totalorder %s708_s4, %s462_s25  ;;  %p465_p2 = scmp.lt.s32.totalorder %s463_s23, %s457_s19 }
  0x56   : > { %p459_p7 = pnand %p458_p6, %p771_p13 }
  0x57   : > { %p466_p4 = por %p465_p2, %p464_p10 }
  0x58   : > { %p460_p8 = pneg %p459_p7 }
  0x5a   : > { %p467_p5 = pnand %p466_p4, %p460_p8 }
  0x5f   : > { %v398_v3 = vpop.eup %397 }
  0x60   : > { %v201_v4 = vadd.f32 1.0, %v398_v3 }
  0x62   : > { %399 = vrcp.f32 %v201_v4 }
  0x6f   : > { %v400_v5 = vpop.eup %399 }
  0x70   : > { %v204_v6 = vmul.f32 %v400_v5, %v197_v1  ;;  %337 = vst [vmem:[%s195_s14 + $0x8] sm:$0xff] %v400_v5 }
  0x72   : > { %211 = vst [vmem:[%s195_s14] sm:$0xff] %v204_v6 }
  0x73   : > { %470 = shalt.err (!%p467_p5)
}
  0x74   : > { %s471_s26 = scalar_lea.hbm %s713_s17, 384  ;;  %s475_s8 = scalar_lea.hbm %s758_s2, 768 }
  0x75   : > { %p472_p9 = scmp.ne.s32.totalorder %s713_s17, %s471_s26  ;;  %p476_p12 = scmp.lt.s32.totalorder %s713_s17, %s758_s2 }
  0x76   : > { %p477_p1 = scmp.lt.s32.totalorder %s475_s8, %s471_s26 }
  0x77   : > { %p473_p0 = pnand %p472_p9, %p771_p13 }
  0x78   : > { %p478_p3 = por %p477_p1, %p476_p12 }
  0x79   : > { %p474_p11 = pneg %p473_p0 }
  0x7b   : > { %p479_p6 = pnand %p478_p3, %p474_p11 }
  0x7d   : > { %482 = shalt.err (!%p479_p6)
}
  0x7e   : > { %s530_s7 = smov 128   ;;  %s531_s29 = smov 8  }
  0x7f   : > { %348 = dma.vmem_to_hbm [thread:$0]  (%p771_p13), %s708_s4, 384, %s713_s17, %s217_s24, %s530_s7, %s530_s7, %s531_s29  }
  0x80 PF: > { %s245_s14 = sand.u32 1, %s513_s9   ;;  %p772_p7 = scmp.ne.s32.totalorder %s764_s22, 0 }
  0x81   : > { %p773_p8 = scmp.ge.s32.totalorder %s525_s12, 2  ;;  %s246_s28 = scalar_lea.sflag [#allocation4], %s245_s14 }
  0x83   : > { %p358_p10 = pnand %p773_p8, %p772_p7 }
  0x85   : > { %p359_p2 = pneg %p358_p10 }
  0x87   : > { %508 = dma.done.wait (%p359_p2), %s246_s28, 384  }
  0x88   : > { %510 = vsyncadd (%p359_p2), %s246_s28, 4294966912  ;;  %p18_p4 = scmp.ge.s32.totalorder %s572_s15, 4   ;;  %s774_s9 = smov %s517_s10 }
  0x89   : > { %s775_s10 = smov %s521_s11  ;;  %s776_s11 = smov %s584_s18 }
  0x8a   : > { %s777_s12 = smov %s572_s15  ;;  %20 = sbr.rel (!%p18_p4) target bundleno = 7 (0x7), region = 88 }
  0x8f   :  { %251 = vsyncpa [#allocation3], 1 }
  0x90   :  { %253 = vsyncpa [#allocation3 + $0x1], 1 }
  0x91   :  { %254 = vsyncpa [#allocation6], 1 }
  0x92   :  { %256 = vsyncpa [#allocation6 + $0x1], 1 }
  0x93   :  { %257 = vsyncpa [#allocation4], 1 }
  0x94   :  { %259 = vsyncpa [#allocation4 + $0x1], 1 }

</bundles_post_ra>
